<compile_context>
chip_gen: v5e
topology: v5e:2x2
jax: 0.10.0
libtpu: 0.0.40
codegen_flags: <defaults>
</compile_context>

<pallas_src>
import jax
import jax.numpy as jnp
from jax import lax
from jax.experimental import pallas as pl
from jax.experimental.pallas import tpu as pltpu


def residual_conv1x1_kernel(x_ref, w_ref, b_ref, o_ref):
    # x_ref: (C_in,  ts)    spatial tile, lane-dense on ts
    # w_ref: (C_in,  C_out) 1x1-conv weight, passed untransposed (grid-resident)
    # b_ref: (C_out, 1)     bias, broadcast over the spatial lanes
    # o_ref: (C_out, ts)
    x = x_ref[...]
    # Contract w's C_in (axis 0) against x's C_in (axis 0) on the MXU; no
    # wrapper-side transpose of w is needed.  f32 accumulation regardless of
    # the activation dtype.
    y = lax.dot_general(
        w_ref[...], x,
        dimension_numbers=(((0,), (0,)), ((), ())),
        preferred_element_type=jnp.float32,
    )
    # fn(x) + x : single f32 add chain, one downcast at the store.
    o_ref[...] = (y + b_ref[...] + x).astype(o_ref.dtype)


def _choose_spatial_tile(HW, max_ts):
    """Largest lane-dense tile <= max_ts, preferring one that evenly divides HW
    so the last grid step is a full, unmasked store (no vst.msk / padded DMA)."""
    if HW <= max_ts:
        return HW
    cap = max((max_ts // 128) * 128, 128)
    if HW % 128 == 0:
        t = min(cap, (HW // 128) * 128)
        while t >= 128:
            if HW % t == 0:
                return t
            t -= 128
    # No lane-dense even divisor fits the budget: ragged last tile fallback
    # (correct: the contraction is only over C; OOB lanes are masked on store).
    return cap


def residual_conv1x1(x_nchw, w, b, *,
                     tile_budget_bytes=24 * 1024 * 1024,
                     vmem_limit_bytes=48 * 1024 * 1024):
    """Residual(Conv2d(C, C, 1)) forward in native NCHW layout.

    x_nchw: (N, C, H, W);  w: (C_in, C_out);  b: (C_out,)
    Activations may be bf16 (halves HBM traffic on this HBM-bound kernel); the
    kernel accumulates in f32 and downcasts only at the store.
    """
    N, C_in, H, W = x_nchw.shape
    C_out = w.shape[1]
    assert w.shape == (C_in, C_out) and b.shape == (C_out,)
    assert C_out == C_in, "residual add requires fn to preserve the channel count"
    HW = H * W

    x3d = x_nchw.reshape(N, C_in, HW)   # free: NCHW is already (N, C, H*W) in memory
    b2d = b.reshape(C_out, 1)
    itemsize = x3d.dtype.itemsize

    # HBM-bound (arithmetic intensity ~ C / (2*itemsize) flop/byte, far below the
    # MXU roofline on v5e/v6e/v7x): grow the spatial tile as large as the VMEM
    # budget allows to amortize the ~0.35us per-step overhead.
    # Per-step VMEM: double-buffered x and out blocks + the resident weight/bias
    # (conservatively counted double-buffered here; on v7x at very large C they
    # could be dropped to pipeline_mode=pl.Buffered(1) since their block index
    # never changes, freeing VMEM for a bigger spatial tile).
    fixed_bytes = 2 * (C_in * C_out + C_out) * itemsize
    bytes_per_lane = 2 * (C_in + C_out) * itemsize
    avail = max(tile_budget_bytes - fixed_bytes, 128 * bytes_per_lane)
    max_ts = max(avail // bytes_per_lane, 128)

    ts_eff = _choose_spatial_tile(HW, max_ts)
    grid_s = pl.cdiv(HW, ts_eff)

    # v7x has two TensorCores: make sure the ("parallel","parallel") grid has at
    # least two steps to shard, even for single-image / single-tile shapes.
    if N * grid_s == 1 and HW % 256 == 0:
        ts_eff = HW // 2            # still a multiple of 128 and divides HW exactly
        grid_s = 2

    # TODO(synk): small-HW bottleneck layers (HW < 128) leave lanes half-empty; a
    # batched-block (fold several images per block) or NHWC variant would restore
    # full 128-lane density there.

    cost = pl.CostEstimate(
        flops=2 * N * HW * C_in * C_out,
        transcendentals=0,
        bytes_accessed=(N * C_in * HW + N * C_out * HW) * itemsize
                       + (C_in * C_out + C_out) * w.dtype.itemsize,
    )

    out3d = pl.pallas_call(
        residual_conv1x1_kernel,
        out_shape=jax.ShapeDtypeStruct((N, C_out, HW), x3d.dtype),
        grid_spec=pltpu.PrefetchScalarGridSpec(
            num_scalar_prefetch=0,
            grid=(N, grid_s),
            in_specs=[
                pl.BlockSpec((None, C_in, ts_eff), lambda n, s: (n, 0, s)),  # x tile
                pl.BlockSpec((C_in, C_out), lambda n, s: (0, 0)),            # weight
                pl.BlockSpec((C_out, 1), lambda n, s: (0, 0)),               # bias
            ],
            out_specs=pl.BlockSpec((None, C_out, ts_eff), lambda n, s: (n, 0, s)),
        ),
        compiler_params=pltpu.CompilerParams(
            # Both grid axes are independent -> shards across v7x's two TCs.
            dimension_semantics=("parallel", "parallel"),
            # Explicit scoped-VMEM limit: the 24 MiB tile budget overflows v5e's
            # 16 MiB default; 48 MiB still leaves headroom inside v7x's 64 MiB.
            vmem_limit_bytes=vmem_limit_bytes,
        ),
        cost_estimate=cost,
    )(x3d, w, b2d)

    return out3d.reshape(N, C_out, H, W)   # free reshape back to NCHW


if __name__ == "__main__":
    key = jax.random.PRNGKey(0)
    kx, kw, kb = jax.random.split(key, 3)

    N, C, H, W = 2, 4, 16, 16
    x = jax.random.normal(kx, (N, C, H, W), dtype=jnp.float32)
    # 1x1-conv parameters: w is (C_in, C_out) for the channel contraction.
    w = jax.random.normal(kw, (C, C), dtype=jnp.float32) * 0.1
    b = jax.random.normal(kb, (C,), dtype=jnp.float32) * 0.1

    out = jax.block_until_ready(residual_conv1x1(x, w, b))

    # pure-JAX reference of fn(x) + x with fn = 1x1 conv (NCHW throughout)
    ref = jnp.einsum("nchw,co->nohw", x, w) + b.reshape(1, C, 1, 1) + x
    assert out.shape == x.shape and out.dtype == x.dtype
    assert jnp.allclose(out, ref, atol=1e-5, rtol=1e-5)

    # bf16 activation path (HBM-bound kernel => ~2x bandwidth win); the kernel
    # still accumulates in f32 and downcasts only at the store.
    out_bf16 = jax.block_until_ready(
        residual_conv1x1(x.astype(jnp.bfloat16),
                         w.astype(jnp.bfloat16),
                         b.astype(jnp.bfloat16)))
    assert out_bf16.shape == x.shape and out_bf16.dtype == jnp.bfloat16
    assert jnp.allclose(out_bf16.astype(jnp.float32), ref, atol=1e-1, rtol=1e-1)

    print("KERNEL_OK")
</pallas_src>

<mosaic_0001>
module attributes {stable_mosaic.version = 11 : i64} {
  func.func @residual_conv1x1_kernel(%arg0: i32, %arg1: i32, %arg2: memref<1x4x256xf32, #tpu.memory_space<vmem>>, %arg3: memref<4x4xf32, #tpu.memory_space<vmem>>, %arg4: memref<4x1xf32, #tpu.memory_space<vmem>>, %arg5: memref<1x4x256xf32, #tpu.memory_space<vmem>>) attributes {dimension_semantics = [#tpu.dimension_semantics<parallel>, #tpu.dimension_semantics<parallel>], iteration_bounds = array<i64: 2, 1>, scalar_prefetch = 0 : i64, scratch_operands = 0 : i64, tpu.core_type = #tpu.core_type<tc>, window_params = [{transform_indices = @transform_0, window_bounds = array<i64: 1, 4, 256>}, {pipeline_mode = #tpu.pipeline_mode<synchronous>, transform_indices = @transform_1, window_bounds = array<i64: 4, 4>}, {pipeline_mode = #tpu.pipeline_mode<synchronous>, transform_indices = @transform_2, window_bounds = array<i64: 4, 1>}, {transform_indices = @transform_3, window_bounds = array<i64: 1, 4, 256>}]} {
    %c0 = arith.constant 0 : index
    %c0_0 = arith.constant 0 : index
    %c0_1 = arith.constant 0 : index
    %0 = vector.load %arg2[%c0, %c0_0, %c0_1] : memref<1x4x256xf32, #tpu.memory_space<vmem>>, vector<1x4x256xf32>
    %1 = vector.shape_cast %0 : vector<1x4x256xf32> to vector<4x256xf32>
    %c0_2 = arith.constant 0 : index
    %c0_3 = arith.constant 0 : index
    %2 = vector.load %arg3[%c0_2, %c0_3] : memref<4x4xf32, #tpu.memory_space<vmem>>, vector<4x4xf32>
    %cst = arith.constant dense<0.000000e+00> : vector<4x256xf32>
    %3 = tpu.matmul %2, %1, %cst {dimension_numbers = #tpu.dot_dimension_numbers<[0], [0], [1], [1], [0, 1, 1, 1], [], []>} : vector<4x4xf32>, vector<4x256xf32>, vector<4x256xf32> -> vector<4x256xf32>
    %c0_4 = arith.constant 0 : index
    %c0_5 = arith.constant 0 : index
    %4 = vector.load %arg4[%c0_4, %c0_5] : memref<4x1xf32, #tpu.memory_space<vmem>>, vector<4x1xf32>
    %5 = vector.broadcast %4 : vector<4x1xf32> to vector<4x256xf32>
    %6 = arith.addf %3, %5 : vector<4x256xf32>
    %7 = arith.addf %6, %1 : vector<4x256xf32>
    %c0_6 = arith.constant 0 : index
    %c0_7 = arith.constant 0 : index
    %c0_8 = arith.constant 0 : index
    %8 = vector.load %arg5[%c0_6, %c0_7, %c0_8] : memref<1x4x256xf32, #tpu.memory_space<vmem>>, vector<1x4x256xf32>
    %9 = vector.shape_cast %8 : vector<1x4x256xf32> to vector<4x256xf32>
    %10 = vector.shape_cast %7 : vector<4x256xf32> to vector<1x4x256xf32>
    tpu.vector_store %arg5[%c0_6, %c0_7, %c0_8], %10 {strides = array<i32>} : memref<1x4x256xf32, #tpu.memory_space<vmem>>, vector<1x4x256xf32>,
    return
  }
  func.func @transform_0(%arg0: i32, %arg1: i32) -> (i32, i32, i32) {
    %c0_i32 = arith.constant 0 : i32
    %c0_i32_0 = arith.constant 0 : i32
    return %arg0, %c0_i32, %arg1 : i32, i32, i32
  }
  func.func @transform_1(%arg0: i32, %arg1: i32) -> (i32, i32) {
    %c0_i32 = arith.constant 0 : i32
    %c0_i32_0 = arith.constant 0 : i32
    %c0_i32_1 = arith.constant 0 : i32
    return %c0_i32, %c0_i32_0 : i32, i32
  }
  func.func @transform_2(%arg0: i32, %arg1: i32) -> (i32, i32) {
    %c0_i32 = arith.constant 0 : i32
    %c0_i32_0 = arith.constant 0 : i32
    %c0_i32_1 = arith.constant 0 : i32
    return %c0_i32, %c0_i32_0 : i32, i32
  }
  func.func @transform_3(%arg0: i32, %arg1: i32) -> (i32, i32, i32) {
    %c0_i32 = arith.constant 0 : i32
    %c0_i32_0 = arith.constant 0 : i32
    return %arg0, %c0_i32, %arg1 : i32, i32, i32
  }
}

</mosaic_0001>

<bundles_post_ra>
// kernel: tpu_custom_call.1
= control target key start
LH: loop header
LB: loop body
LE: loop exit
PB: predicated region body
PF: predicated region fallthrough
CT: control target
= control target key end

     0   :  { %8 = vsyncpa [#allocation3], 0  ;;  %s772_s0 = inlined_call_operand.hbm [shape: f32[2,4,256], index: 0, kind: input, shape index: {}]   ;;  %s773_s1 = inlined_call_operand.vmem [shape: f32[4,4], index: 1, kind: input, shape index: {}]   ;;  %s774_s2 = inlined_call_operand.vmem [shape: f32[4,1], index: 2, kind: input, shape index: {}]   ;;  %s775_s3 = inlined_call_operand.hbm [shape: f32[2,4,256], index: 3, kind: output, shape index: {}]  }
   0x1   :  { %10 = vsyncpa [#allocation3 + $0x1], 0 }
   0x2   :  { %11 = vsyncpa [#allocation4], 0 }
   0x3   :  { %13 = vsyncpa [#allocation4 + $0x1], 0  ;;  %s639_s12 = smov 0   ;;  %s641_s13 = smov 0  }
   0x4   :  { %s643_s14 = smov 0   ;;  %s645_s15 = smov 0  }
   0x5   :  { %s647_s16 = smov 0   ;;  %s649_s17 = smov 0  }
   0x6 LB: > { %s418_s18 = sadd.s32 4294967295, %s616_s17   ;;  %s419_s19 = sadd.s32 4294967294, %s616_s17   ;;  %s616_s17 = sphi %s649_s17, %s19_s17   ;;  %s612_s16 = sphi %s647_s16, %s784_s16   ;;  %s608_s15 = sphi %s645_s15, %s783_s15   ;;  %s604_s14 = sphi %s643_s14, %s782_s14   ;;  %s600_s13 = sphi %s641_s13, %s781_s13   ;;  %s596_s12 = sphi %s639_s12, %s780_s12  }
   0x7   : > { %s31_s20 = sadd.s32 1, %s612_s16  ;;  %s40_s21 = sadd.s32 1, %s604_s14 }
   0x8   : > { %p33_p0 = scmp.ge.s32.totalorder %s31_s20, 2  ;;  %p47_p1 = scmp.ne.s32.totalorder %s604_s14, %s600_s13 }
   0x9   : > { %p48_p2 = scmp.eq.s32.totalorder %s616_s17, 0  ;;  %p53_p3 = scmp.ne.s32.totalorder %s600_s13, %s596_s12 }
   0xa   : > { %s786_s20 = smov (%p33_p0, %s31_s20), 0  ;;  %p54_p5 = scmp.eq.s32.totalorder %s418_s18, 0 }
   0xb   : > { %p680_p4 = por %p48_p2, %p47_p1  ;;  %s35_s23 = ssub.s32 %s612_s16, %s786_s20 }
   0xc   : > { %p121_p6 = scmp.eq.s32.totalorder %s418_s18, 1  ;;  %p38_p7 = scmp.eq.s32.totalorder %s35_s23, 0 }
   0xd   : > { %p686_p8 = por %p54_p5, %p53_p3  ;;  %p127_p10 = scmp.eq.s32.totalorder %s419_s19, 1 }
   0xe   : > { %p690_p9 = por %p121_p6, %p47_p1  ;;  %p421_p12 = scmp.ge.s32.totalorder %s616_s17, 2 }
   0xf   : > { %s695_s26 = scalar_select %p38_p7, %s604_s14, %s40_s21  }
  0x10   : > { %p697_p11 = por %p127_p10, %p53_p3  ;;  %p451_p13 = scmp.lt.s32.totalorder %s616_s17, 2 }
  0x11   : > { %s153_s28 = sand.u32 1, %s604_s14   ;;  %s437_s30 = sshll.u32 %s612_s16, 3 }
  0x12   : > { %s422_s29 = sshll.u32 %s153_s28, 3  ;;  %s164_s6 = scalar_lea.hbm %s772_s0, %s437_s30 }
  0x13   : > { %s157_s7 = scalar_lea.vmem [#allocation2], %s422_s29  ;;  %s166_s9 = sshll.u32 %s164_s6, 4  ;;  %s167_s9 = int_to_ptr.hbm [resolvable:$true] %s166_s9 }
  0x14   : > { %s168_s8 = sshll.u32 %s157_s7, 4  ;;  %p444_p0 = pnand %p451_p13, %p680_p4  ;;  %s169_s8 = int_to_ptr.vmem [resolvable:$true] %s168_s8 }
  0x15   : > { %p425_p1 = scmp.ge.s32.totalorder %s616_s17, 1  ;;  %p173_p2 = scmp.lt.s32.totalorder %s616_s17, 3 }
  0x16   : > { %s154_s10 = scalar_lea.sflag [#allocation3], %s153_s28 }
  0x17   : > { %446 = dma.hbm_to_vmem [thread:$0]  (!%p444_p0), %s167_s9, 128, %s169_s8, %s154_s10  }
  0x18   : > { %p174_p3 = pnand %p425_p1, %p173_p2 }
  0x19   : > { %s713_s11 = sand.u32 (!%p174_p3), 1, %s600_s13  }
  0x1a   : > { %177 = sbr.rel (%p174_p3) target bundleno = 334 (0x14e), region = 32  ;;  %s426_s18 = sshll.u32 (!%p174_p3), %s713_s11, 3 }
  0x1b   : > { %s180_s19 = scalar_lea.sflag (!%p174_p3), [#allocation3], %s713_s11  ;;  %s183_s21 = scalar_lea.vmem (!%p174_p3), [#allocation2], %s426_s18 }
  0x1f   : > { %587 = dma.done.wait (%p686_p8), %s180_s19, 128  }
  0x20   : > { %589 = vsyncadd (%p686_p8), %s180_s19, 4294967168  ;;  %v209_v0 = vld [vmem:[%s183_s21] sm:$0xff]  ;;  %v210_v1 = vld [vmem:[%s773_s1] sm:$0xf]  ;;  %vm257_vm0 = vcmask 1043456   ;;  %v618_v5 = vmov 0  }
  0x21   : > { %250 = vst [vmem:[#allocation1] ss:$2 sm:$0xff] %v209_v0  ;;  %217 = vxpose.xlu0.b32.start.end [1/1] (short) (narrow) %v210_v1, 8  ;;  %v211_v4 = vld [vmem:[%s774_s2] sm:$0xf]  ;;  %vm253_vm1 = vcmask 31744  }
  0x22   : > { %s438_s24 = sshll.u32 %s608_s15, 3  ;;  %s206_s6 = scalar_lea.vmem [#allocation5], %s426_s18 }
  0x23   : > { %s329_s5 = scalar_lea.hbm %s775_s3, %s438_s24  ;;  %s331_s7 = sshll.u32 %s206_s6, 4  ;;  %s332_s7 = int_to_ptr.vmem [resolvable:$true] %s331_s7 }
  0x24   : > { %s333_s8 = sshll.u32 %s329_s5, 4  ;;  %s316_s15 = scalar_lea.sflag [#allocation4], %s713_s11  ;;  %s334_s8 = int_to_ptr.hbm [resolvable:$true] %s333_s8 }
  0x25   : > { %s548_s9 = sshra.s32 %s334_s8, 4  ;;  %s554_s18 = scalar_lea.hbm %s775_s3, 16  ;;  %s549_s9 = int_to_ptr.hbm [resolvable:$true] %s548_s9 }
  0x26   : > { %s550_s10 = scalar_lea.hbm %s549_s9, 8  ;;  %p555_p7 = scmp.lt.s32.totalorder %s549_s9, %s775_s3 }
  0x27   : > { %p551_p4 = scmp.ne.s32.totalorder %s549_s9, %s550_s10  ;;  %p556_p8 = scmp.lt.s32.totalorder %s554_s18, %s550_s10 }
  0x28   : > { %v251_v2 = vld.sshfl [vmem:[#allocation1] sm:$0xff pattern:$0x75316420]  ;;  %v252_v3 = vld.sshfl [vmem:[#allocation1 + $0x8] sm:$0xff pattern:$0x75316420] }
  0x29   : > { %428 = vmatpush.msk.msra.mxu0 %vm257_vm0, %v251_v2  ;;  %430 = vmatpush.msk.msra.mxu1 %vm257_vm0, %v252_v3  ;;  %302 = vst [vmem:[#allocation1] ss:$2 sm:$0xff] %v209_v0  ;;  %p552_p5 = pnand %p551_p4, %p690_p9  ;;  %p557_p10 = por %p556_p8, %p555_p7 }
  0x2b   : > { %p553_p6 = pneg %p552_p5 }
  0x2d   : > { %p558_p13 = pnand %p557_p10, %p553_p6 }
  0x30   : > { %v304_v10 = vld.sshfl [vmem:[#allocation1 + $0x8] sm:$0xff pattern:$0x75316420]  ;;  %v303_v13 = vld.sshfl [vmem:[#allocation1] sm:$0xff pattern:$0x75316420] }
  0x88   : > { %503 = vset.pattern.permute.xlu0 %v618_v5 }
  0x8f   : > { %214 = vperm.xlu0 %503, %v211_v4  }
  0xc5   : > { %v233_v6 = vpop.trf.xlu0 }
  0xc6   : > { %429 = vmatmul.msk.f32.vlgmr.msra.gmra.mxu0 %vm253_vm1, %v233_v6  ;;  %431 = vmatmul.msk.f32.vlgmr.msra.gmra.mxu1 %vm253_vm1, %v233_v6 }
 0x101   : > { %v215_v7 = vpop.permute.xlu0 %214 }
 0x143   : > { %v279_v8 = vpop.f32.mrf.mxu0  ;;  %v299_v9 = vpop.f32.mrf.mxu1 }
 0x144   : > { %v280_v11 = vadd.f32 %v279_v8, %v215_v7  ;;  %v300_v12 = vadd.f32 %v299_v9, %v215_v7 }
 0x146   : > { %v308_v14 = vadd.f32 %v304_v10, %v300_v12  ;;  %v307_v15 = vadd.f32 %v303_v13, %v280_v11 }
 0x148   : > { %v311_v16 = vrot.slane %v308_v14, 4 }
 0x14a   : > { %v312_v17 = vsel %vm257_vm0, %v307_v15, %v311_v16 }
 0x14b   : > { %314 = vst [vmem:[%s206_s6] sm:$0xff] %v312_v17 }
 0x14c   : > { %561 = shalt.err (!%p558_p13)
}
 0x14d   : > { %441 = dma.vmem_to_hbm [thread:$0]  (%p690_p9), %s332_s7, 128, %s334_s8, %s316_s15  }
 0x14e PF: > { %s345_s11 = sand.u32 1, %s596_s12   ;;  %p448_p0 = pnand %p421_p12, %p697_p11 }
 0x14f   : > { %s346_s28 = scalar_lea.sflag [#allocation4], %s345_s11 }
 0x150   : > { %p449_p1 = pneg %p448_p0 }
 0x152   : > { %591 = dma.done.wait (%p449_p1), %s346_s28, 128  }
 0x153   : > { %593 = vsyncadd (%p449_p1), %s346_s28, 4294967168  ;;  %s19_s17 = sadd.s32 1, %s616_s17   ;;  %s780_s12 = smov %s600_s13 }
 0x154   : > { %p16_p2 = scmp.ge.s32.totalorder %s19_s17, 4   ;;  %s781_s13 = smov %s604_s14 }
 0x155   : > { %s782_s14 = smov %s695_s26  ;;  %s783_s15 = smov %s612_s16 }
 0x156   : > { %s784_s16 = smov %s786_s20  ;;  %18 = sbr.rel (!%p16_p2) target bundleno = 6 (0x6), region = 77 }
 0x15b   :  { %352 = vsyncpa [#allocation3], 1 }
 0x15c   :  { %354 = vsyncpa [#allocation3 + $0x1], 1 }
 0x15d   :  { %355 = vsyncpa [#allocation4], 1 }
 0x15e   :  { %357 = vsyncpa [#allocation4 + $0x1], 1 }

</bundles_post_ra>
